<compile_context>
chip_gen: v7x
topology: tpu7x:2x2x1
jax: 0.10.0
libtpu: 0.0.40
codegen_flags: <defaults>
</compile_context>

<pallas_src>
import math

import jax
import jax.numpy as jnp
from jax.experimental import pallas as pl
from jax.experimental.pallas import tpu as pltpu


def _layer_scale_kernel(x_ref, gamma_ref, o_ref):
    # x_ref: (TM, LW) tile; gamma_ref: (1, LW), resident across the whole grid
    # (constant index_map -> no re-DMA per step).  Broadcast multiply on VPU.
    o_ref[...] = (x_ref[...] * gamma_ref[...]).astype(o_ref.dtype)


def _layer_scale_2d(x2, g_row, *, target_block_bytes, donate_x):
    """Lane-dense core: x2 (rows, lw) with lw % 128 == 0 (or lw == full D),
    g_row (1, lw).  Returns x2 * g_row, dtype = x2.dtype."""
    rows, lw = x2.shape
    itemsize = jnp.dtype(x2.dtype).itemsize

    # Sublane-aligned row tile for this dtype: 8 (f32) / 16 (bf16) / 32 (int8).
    sub = 8 * max(1, 4 // itemsize)

    # Keep 4x the block (in + out, double-buffered) well under 48 MiB scoped
    # VMEM (v7x has only 64 MiB physical per TC).
    max_block_bytes = (48 * 1024 * 1024 - 2 * 1024 * 1024) // 4
    block_bytes_target = min(int(target_block_bytes), max_block_bytes)

    if rows <= sub:
        tm = rows                                    # full-extent block is always legal
    else:
        tm = block_bytes_target // (lw * itemsize)
        tm = max(sub, (tm // sub) * sub)
        # Cap so grid has >= 2 steps: both v7x TCs get work under "parallel".
        half = ((rows + 1) // 2 + sub - 1) // sub * sub
        tm = min(tm, half)

    grid = (pl.cdiv(rows, tm),)

    block_bytes = tm * lw * itemsize
    vmem_limit = min(48 * 1024 * 1024,
                     max(32 * 1024 * 1024, 4 * block_bytes + 2 * 1024 * 1024))

    gamma_bytes = lw * jnp.dtype(g_row.dtype).itemsize
    cost = pl.CostEstimate(
        flops=rows * lw,
        transcendentals=0,
        bytes_accessed=2 * rows * lw * itemsize + gamma_bytes,
    )

    return pl.pallas_call(
        _layer_scale_kernel,
        out_shape=jax.ShapeDtypeStruct((rows, lw), x2.dtype),
        grid_spec=pltpu.PrefetchScalarGridSpec(
            num_scalar_prefetch=0,
            grid=grid,
            in_specs=[
                pl.BlockSpec((tm, lw), lambda i: (i, 0)),
                # Constant block index: gamma stays resident in VMEM.
                pl.BlockSpec((1, lw), lambda i: (0, 0)),
            ],
            out_specs=pl.BlockSpec((tm, lw), lambda i: (i, 0)),
        ),
        compiler_params=pltpu.CompilerParams(
            dimension_semantics=("parallel",),       # shards row grid across TCs (v7x)
            vmem_limit_bytes=vmem_limit,
        ),
        cost_estimate=cost,
        input_output_aliases=({0: 0} if donate_x else {}),
    )(x2, g_row)


def layer_scale(x, gamma, *, target_block_bytes=4 * 1024 * 1024, donate_x=False):
    """x: (..., D), gamma: (D,). Returns x * gamma broadcast over the last dim.

    Output dtype == x.dtype (gamma is cast to the activation dtype), matching
    the usual "module cast to bf16" convention rather than eager promotion.
    donate_x=True mirrors PyTorch's inplace=True (writes into x's HBM buffer).
    """
    orig_shape = x.shape
    D = orig_shape[-1]
    rows0 = x.size // D
    x2 = x.reshape(rows0, D)
    g = gamma.astype(x.dtype)

    if D % 128 == 0:
        out2 = _layer_scale_2d(x2, g.reshape(1, D),
                               target_block_bytes=target_block_bytes,
                               donate_x=donate_x)
        return out2.reshape(orig_shape)

    # Repack so the lane (last) dim is lcm(D, 128): unmasked lane-dense stores.
    lw = D * 128 // math.gcd(D, 128)                 # lcm(D, 128)
    group = lw // D                                  # rows packed per lane-dense row
    rows_main = (rows0 // group) * group

    parts = []
    if rows_main > 0:
        xm = x2[:rows_main].reshape(rows_main // group, lw)
        gm = jnp.tile(g, group).reshape(1, lw)
        out_m = _layer_scale_2d(xm, gm,
                                target_block_bytes=target_block_bytes,
                                donate_x=donate_x)
        parts.append(out_m.reshape(rows_main, D))
    if rows_main < rows0:
        # Tiny ragged tail (< 128/gcd(D,128) rows): plain jnp, negligible cost.
        parts.append((x2[rows_main:] * g).astype(x.dtype))

    out2 = parts[0] if len(parts) == 1 else jnp.concatenate(parts, axis=0)
    return out2.reshape(orig_shape)


if __name__ == "__main__":
    init_values = 1e-5
    key = jax.random.PRNGKey(0)
    k0, k1, k2 = jax.random.split(key, 3)

    # Primary case from the module spec: (B, N, D) = (2, 8, 32).
    B, N, D = 2, 8, 32
    x = jax.random.normal(k0, (B, N, D), dtype=jnp.float32)
    gamma = init_values * jnp.ones((D,), dtype=jnp.float32)
    out = jax.block_until_ready(layer_scale(x, gamma))
    assert out.shape == x.shape and out.dtype == x.dtype
    assert jnp.allclose(out, x * gamma, atol=1e-6, rtol=1e-6)

    # Multi-step pipelined grid + partial last row tile (D % 128 == 0).
    x1 = jax.random.normal(k1, (4, 197, 384), dtype=jnp.float32)   # rows = 788
    g1 = init_values * jnp.ones((384,), dtype=jnp.float32)
    o1 = jax.block_until_ready(layer_scale(x1, g1, target_block_bytes=256 * 1024))
    assert jnp.allclose(o1, x1 * g1, atol=1e-6, rtol=1e-6)

    # Lane-repack path with a ragged tail (rows % group != 0 for D = 32).
    x2 = jax.random.normal(k2, (3, 7, 32), dtype=jnp.float32)
    g2 = init_values * jnp.ones((32,), dtype=jnp.float32)
    o2 = jax.block_until_ready(layer_scale(x2, g2))
    assert jnp.allclose(o2, x2 * g2, atol=1e-6, rtol=1e-6)

    print("KERNEL_OK")
</pallas_src>

<mosaic_0001>
module attributes {stable_mosaic.version = 11 : i64} {
  func.func @_layer_scale_kernel(%arg0: i32, %arg1: memref<4x128xf32, #tpu.memory_space<vmem>>, %arg2: memref<1x128xf32, #tpu.memory_space<vmem>>, %arg3: memref<4x128xf32, #tpu.memory_space<vmem>>) attributes {dimension_semantics = [#tpu.dimension_semantics<parallel>], iteration_bounds = array<i64: 1>, scalar_prefetch = 0 : i64, scratch_operands = 0 : i64, tpu.core_type = #tpu.core_type<tc>, window_params = [{transform_indices = @transform_0, window_bounds = array<i64: 4, 128>}, {pipeline_mode = #tpu.pipeline_mode<synchronous>, transform_indices = @transform_1, window_bounds = array<i64: 1, 128>}, {transform_indices = @transform_2, window_bounds = array<i64: 4, 128>}]} {
    %c0 = arith.constant 0 : index
    %c0_0 = arith.constant 0 : index
    %0 = vector.load %arg1[%c0, %c0_0] : memref<4x128xf32, #tpu.memory_space<vmem>>, vector<4x128xf32>
    %c0_1 = arith.constant 0 : index
    %c0_2 = arith.constant 0 : index
    %1 = vector.load %arg2[%c0_1, %c0_2] : memref<1x128xf32, #tpu.memory_space<vmem>>, vector<1x128xf32>
    %2 = vector.broadcast %1 : vector<1x128xf32> to vector<4x128xf32>
    %3 = arith.mulf %0, %2 : vector<4x128xf32>
    %c0_3 = arith.constant 0 : index
    %c0_4 = arith.constant 0 : index
    %4 = vector.load %arg3[%c0_3, %c0_4] : memref<4x128xf32, #tpu.memory_space<vmem>>, vector<4x128xf32>
    tpu.vector_store %arg3[%c0_3, %c0_4], %3 {strides = array<i32>} : memref<4x128xf32, #tpu.memory_space<vmem>>, vector<4x128xf32>,
    return
  }
  func.func @transform_0(%arg0: i32) -> (i32, i32) {
    %c0_i32 = arith.constant 0 : i32
    %c0_i32_0 = arith.constant 0 : i32
    return %arg0, %c0_i32 : i32, i32
  }
  func.func @transform_1(%arg0: i32) -> (i32, i32) {
    %c0_i32 = arith.constant 0 : i32
    %c0_i32_0 = arith.constant 0 : i32
    %c0_i32_1 = arith.constant 0 : i32
    return %c0_i32, %c0_i32_0 : i32, i32
  }
  func.func @transform_2(%arg0: i32) -> (i32, i32) {
    %c0_i32 = arith.constant 0 : i32
    %c0_i32_0 = arith.constant 0 : i32
    return %arg0, %c0_i32 : i32, i32
  }
}

</mosaic_0001>

<bundles_post_ra>
// kernel: tpu_custom_call.1
= control target key start
LH: loop header
LB: loop body
LE: loop exit
PB: predicated region body
PF: predicated region fallthrough
CT: control target
= control target key end

     0   :  { %7 = vsyncpa [#allocation3], 0  ;;  %s144_s0 = inlined_call_operand.hbm [shape: f32[4,128], index: 0, kind: input, shape index: {}]   ;;  %s145_s1 = inlined_call_operand.vmem [shape: f32[1,128], index: 1, kind: input, shape index: {}]   ;;  %s146_s2 = inlined_call_operand.hbm [shape: f32[4,128], index: 2, kind: output, shape index: {}]  }
   0x1   :  { %8 = vsyncpa [#allocation4], 0  ;;  %s100_s9 = smov [#allocation2]   ;;  %s52_s13 = scalar_lea.hbm %s144_s0, 64 }
   0x2   :  { %s15_s10 = sshll.u32 %s100_s9, 4  ;;  %p53_p0 = scmp.ne.s32.totalorder %s144_s0, %s52_s13  ;;  %s16_s10 = int_to_ptr.vmem [resolvable:$true] %s15_s10 }
   0x3   :  { %p56_p1 = scmp.lt.u32.totalorder %s52_s13, %s144_s0 }
   0x5   :  { %p58_p2 = pnand %p56_p1, %p53_p0 }
   0x7   :  { %61 = shalt.err (!%p58_p2)
}
   0x8   :  { %s62_s18 = scalar_lea.vmem %s16_s10, 64  ;;  %p67_p4 = scmp.lt.s32.totalorder %s16_s10, %s16_s10 }
   0x9   :  { %p63_p3 = scmp.ne.s32.totalorder %s16_s10, %s62_s18  ;;  %p68_p5 = scmp.lt.s32.totalorder %s62_s18, %s62_s18 }
   0xb   :  { %p69_p6 = por %p68_p5, %p67_p4 }
   0xd   :  { %p70_p7 = pnand %p69_p6, %p63_p3 }
   0xf   :  { %73 = shalt.err (!%p70_p7)
}
  0x10   :  { %18 = dma.hbm_to_vmem [thread:$0]  %s144_s0, 64, %s16_s10, [#allocation3]  }
  0x11   :  { %96 = dma.done.wait [#allocation3], 64  }
  0x12   :  { %97 = vsyncadd [#allocation3], 4294967232  ;;  %s101_s21 = smov [#allocation5]   ;;  %v24_v0 = vld [vmem:[#allocation2] sm:$0xf] }
  0x13   :  { %s40_s22 = sshll.u32 %s101_s21, 4  ;;  %v49_v1 = vld [vmem:[%s145_s1] ss:$0 sm:$0xff]  ;;  %s41_s22 = int_to_ptr.vmem [resolvable:$true] %s40_s22 }
  0x14   :  { %v32_v2 = vmul.f32 %v49_v1, %v24_v0  ;;  %s74_s25 = scalar_lea.vmem %s41_s22, 64  ;;  %p79_p9 = scmp.lt.s32.totalorder %s41_s22, %s41_s22 }
  0x15   :  { %p75_p8 = scmp.ne.s32.totalorder %s41_s22, %s74_s25  ;;  %p80_p10 = scmp.lt.s32.totalorder %s74_s25, %s74_s25 }
  0x16   :  { %33 = vst [vmem:[#allocation5] sm:$0xf] %v32_v2 }
  0x17   :  { %p81_p11 = por %p80_p10, %p79_p9 }
  0x19   :  { %p82_p12 = pnand %p81_p11, %p75_p8 }
  0x1b   :  { %85 = shalt.err (!%p82_p12)
}
  0x1c   :  { %s86_s27 = scalar_lea.hbm %s146_s2, 64 }
  0x1d   :  { %p87_p13 = scmp.ne.s32.totalorder %s146_s2, %s86_s27  ;;  %p90_p0 = scmp.lt.u32.totalorder %s86_s27, %s146_s2 }
  0x1f   :  { %p92_p1 = pnand %p90_p0, %p87_p13 }
  0x21   :  { %95 = shalt.err (!%p92_p1)
}
  0x22   :  { %43 = dma.vmem_to_hbm [thread:$0]  %s41_s22, 64, %s146_s2, [#allocation4]  }
  0x23   :  { %98 = dma.done.wait [#allocation4], 64  }
  0x24   :  { %99 = vsyncadd [#allocation4], 4294967232 }
  0x25   :  { %47 = vsyncpa [#allocation3], 1 }
  0x26   :  { %48 = vsyncpa [#allocation4], 1 }

</bundles_post_ra>
